<compile_context>
chip_gen: v7x
topology: tpu7x:2x2x1
jax: 0.10.0
libtpu: 0.0.40
codegen_flags: <defaults>
</compile_context>

<pallas_src>
import functools

import jax
import jax.numpy as jnp
from jax.experimental import pallas as pl
from jax.experimental.pallas import tpu as pltpu

EPS = 1e-5


def _ceil8(n):
    return ((n + 7) // 8) * 8


def _instance_norm(h, g, b):
    """h: (C, HW) for one sample; g, b: (C, 1). Biased variance, eps=1e-5."""
    # Both reductions issue directly from h (overlap in the XLU).
    m = jnp.mean(h, axis=-1, keepdims=True)
    ms = jnp.mean(h * h, axis=-1, keepdims=True)
    v = jnp.maximum(ms - m * m, 0.0)          # guard tiny negative cancellation
    return (h - m) * (g * jax.lax.rsqrt(v + EPS)) + b


def _residual_block_kernel(x_ref, w_ref, gb_ref, mask_ref, o_ref,
                           *, H, W, K, C, C2, NB, w_rows, gb_rows):
    HW = H * W
    P = K // 2
    KK = K * K
    r1, r2, r3 = w_rows
    o1, o2, o3, o4, o5, o6 = gb_rows

    # ---- unpack consolidated parameters (once per grid step) ----
    w1 = w_ref[r1:r1 + C2, 0:C]               # (C2, C)
    w2 = w_ref[r2:r2 + C2, 0:KK * C2]         # (C2, K*K*C2)  [tap major, cin minor]
    w3 = w_ref[r3:r3 + C, 0:C2]               # (C, C2)
    g1 = gb_ref[o1:o1 + C2, :]; b1 = gb_ref[o2:o2 + C2, :]
    g2 = gb_ref[o3:o3 + C2, :]; b2 = gb_ref[o4:o4 + C2, :]
    g3 = gb_ref[o5:o5 + C, :];  b3 = gb_ref[o6:o6 + C, :]
    mask = mask_ref[...]                      # (K*K*C2, HW) border mask, f32

    for n in range(NB):                       # NB = 1 (multi-TC) or N (single-TC)
        x = x_ref[n].astype(jnp.float32)      # (C, HW), lane-dense

        # ---- 1x1 conv (C -> C2) on the MXU ----
        h = jnp.dot(w1, x, preferred_element_type=jnp.float32)        # (C2, HW)
        h = jnp.maximum(_instance_norm(h, g1, b1), 0.0)

        # ---- KxK conv (C2 -> C2) as one register-resident im2col matmul ----
        # tap t = (dy, dx) reads h at pixel offset s = (dy-P)*W + (dx-P);
        # pltpu.roll(h, (-s) % HW) puts h[p + s] at lane p (XLU lane rotate);
        # wrapped / out-of-image lanes are zeroed by the precomputed mask.
        taps = []
        for t in range(KK):
            dy, dx = t // K, t % K
            s = (dy - P) * W + (dx - P)
            taps.append(h if s == 0 else pltpu.roll(h, (-s) % HW, axis=1))
        col = jnp.concatenate(taps, axis=0) * mask                     # (KK*C2, HW)
        h = jnp.dot(w2, col, preferred_element_type=jnp.float32)       # (C2, HW)
        h = jnp.maximum(_instance_norm(h, g2, b2), 0.0)

        # ---- 1x1 conv (C2 -> C), final IN, residual add + ReLU ----
        h = jnp.dot(w3, h, preferred_element_type=jnp.float32)         # (C, HW)
        z = _instance_norm(h, g3, b3)
        o_ref[n] = jnp.maximum(z + x, 0.0).astype(o_ref.dtype)         # lane-dense


def _parallel_samples_over_cores():
    """True when one JAX device exposes >1 TensorCore (v7x / megacore v4/v5p):
    then grid=(N,) + "parallel" shards samples across cores.  On single-TC
    v5e/v6e we collapse the grid to one step instead (conservative default)."""
    try:
        kind = jax.devices()[0].device_kind.lower()
    except Exception:
        return False
    return any(tag in kind for tag in ("v7", "7x", "v4", "v5p"))


def base_residual_block(x_nchw, params, *, kernel_size):
    """x_nchw: (N, C, H, W) float32. Returns (N, C, H, W)."""
    N, C, H, W = x_nchw.shape
    C2 = C // 2
    K = kernel_size
    P = K // 2
    KK = K * K
    HW = H * W

    x_flat = x_nchw.reshape(N, C, HW)   # channels -> sublanes, spatial -> lanes

    # --- consolidated weight slab: [w1 | w2 (im2col-packed) | w3] ---
    r1 = 0
    r2 = r1 + _ceil8(C2)
    r3 = r2 + _ceil8(C2)
    w_nrows = r3 + _ceil8(C)
    w_ncols = max(C, KK * C2, C2)
    # conv2 OIHW -> (C2_out, K*K*C2_in), rows [tap(dy,dx) major, cin minor]
    w2k = params["w2"].transpose(0, 2, 3, 1).reshape(C2, KK * C2)
    wpack = jnp.zeros((w_nrows, w_ncols), jnp.float32)
    wpack = wpack.at[r1:r1 + C2, 0:C].set(params["w1"])
    wpack = wpack.at[r2:r2 + C2, 0:KK * C2].set(w2k)
    wpack = wpack.at[r3:r3 + C, 0:C2].set(params["w3"])

    # --- consolidated gamma/beta slab (sublane-8-aligned segments) ---
    o1 = 0
    o2 = o1 + _ceil8(C2)
    o3 = o2 + _ceil8(C2)
    o4 = o3 + _ceil8(C2)
    o5 = o4 + _ceil8(C2)
    o6 = o5 + _ceil8(C)
    gb_nrows = o6 + _ceil8(C)
    gbpack = jnp.zeros((gb_nrows, 1), jnp.float32)
    gbpack = gbpack.at[o1:o1 + C2, 0].set(params["g1"])
    gbpack = gbpack.at[o2:o2 + C2, 0].set(params["b1"])
    gbpack = gbpack.at[o3:o3 + C2, 0].set(params["g2"])
    gbpack = gbpack.at[o4:o4 + C2, 0].set(params["b2"])
    gbpack = gbpack.at[o5:o5 + C, 0].set(params["g3"])
    gbpack = gbpack.at[o6:o6 + C, 0].set(params["b3"])

    # --- precomputed border masks for the K*K taps ---
    idx = jnp.arange(HW, dtype=jnp.int32)
    ri, ci = idx // W, idx % W
    rows = []
    for t in range(KK):
        oy, ox = t // K - P, t % K - P
        valid = ((ri + oy >= 0) & (ri + oy < H) &
                 (ci + ox >= 0) & (ci + ox < W)).astype(jnp.float32)
        rows.append(jnp.broadcast_to(valid[None, :], (C2, HW)))
    mask = jnp.concatenate(rows, axis=0)            # (K*K*C2, HW)

    multi_tc = _parallel_samples_over_cores()
    NB = 1 if multi_tc else N                       # samples per grid step
    grid = (N // NB,)
    sem = ("parallel",) if multi_tc else ("arbitrary",)

    kernel = functools.partial(
        _residual_block_kernel, H=H, W=W, K=K, C=C, C2=C2, NB=NB,
        w_rows=(r1, r2, r3), gb_rows=(o1, o2, o3, o4, o5, o6))

    out_flat = pl.pallas_call(
        kernel,
        out_shape=jax.ShapeDtypeStruct((N, C, HW), x_nchw.dtype),
        grid_spec=pltpu.PrefetchScalarGridSpec(
            num_scalar_prefetch=0,
            grid=grid,
            in_specs=[
                pl.BlockSpec((NB, C, HW), lambda n: (n, 0, 0)),      # x
                pl.BlockSpec((w_nrows, w_ncols), lambda n: (0, 0)),  # packed weights
                pl.BlockSpec((gb_nrows, 1), lambda n: (0, 0)),       # packed gamma/beta
                pl.BlockSpec((KK * C2, HW), lambda n: (0, 0)),       # border mask
            ],
            out_specs=pl.BlockSpec((NB, C, HW), lambda n: (n, 0, 0)),
        ),
        compiler_params=pltpu.CompilerParams(dimension_semantics=sem),
    )(x_flat, wpack, gbpack, mask)

    return out_flat.reshape(N, C, H, W)


def reference_forward(x, params):
    """Pure-JAX (NCHW / OIHW) reference for validation."""
    def inorm(h, g, b):
        m = jnp.mean(h, axis=(2, 3), keepdims=True)
        v = jnp.mean((h - m) ** 2, axis=(2, 3), keepdims=True)
        return ((h - m) * jax.lax.rsqrt(v + EPS) * g.reshape(1, -1, 1, 1)
                + b.reshape(1, -1, 1, 1))

    dn = ("NCHW", "OIHW", "NCHW")
    h = jax.lax.conv_general_dilated(x, params["w1"][:, :, None, None],
                                     (1, 1), "VALID", dimension_numbers=dn)
    h = jax.nn.relu(inorm(h, params["g1"], params["b1"]))
    h = jax.lax.conv_general_dilated(h, params["w2"], (1, 1), "SAME",
                                     dimension_numbers=dn)
    h = jax.nn.relu(inorm(h, params["g2"], params["b2"]))
    h = jax.lax.conv_general_dilated(h, params["w3"][:, :, None, None],
                                     (1, 1), "VALID", dimension_numbers=dn)
    z = inorm(h, params["g3"], params["b3"])
    return jax.nn.relu(z + x)


def make_params(key, features, kernel_size):
    C, C2, K = features, features // 2, kernel_size
    ks = jax.random.split(key, 9)
    return {
        "w1": 0.2 * jax.random.normal(ks[0], (C2, C), jnp.float32),        # 1x1 (out,in)
        "g1": 1.0 + 0.1 * jax.random.normal(ks[1], (C2,), jnp.float32),
        "b1": 0.1 * jax.random.normal(ks[2], (C2,), jnp.float32),
        "w2": 0.2 * jax.random.normal(ks[3], (C2, C2, K, K), jnp.float32),  # OIHW
        "g2": 1.0 + 0.1 * jax.random.normal(ks[4], (C2,), jnp.float32),
        "b2": 0.1 * jax.random.normal(ks[5], (C2,), jnp.float32),
        "w3": 0.2 * jax.random.normal(ks[6], (C, C2), jnp.float32),        # 1x1 (out,in)
        "g3": 1.0 + 0.1 * jax.random.normal(ks[7], (C,), jnp.float32),
        "b3": 0.1 * jax.random.normal(ks[8], (C,), jnp.float32),
    }


if __name__ == "__main__":
    key = jax.random.PRNGKey(0)
    kx, kp = jax.random.split(key)

    N, C, H, W = 2, 8, 16, 16          # features=8 -> bottleneck features//2=4
    kernel_size = 3

    x = jax.random.normal(kx, (N, C, H, W), jnp.float32)
    params = make_params(kp, C, kernel_size)

    out = jax.block_until_ready(
        base_residual_block(x, params, kernel_size=kernel_size))
    ref = jax.block_until_ready(reference_forward(x, params))

    assert out.shape == (N, C, H, W)
    assert jnp.allclose(out, ref, atol=1e-4, rtol=1e-4), (
        float(jnp.max(jnp.abs(out - ref))))

    print("KERNEL_OK")
</pallas_src>

<mosaic_0001>
module attributes {stable_mosaic.version = 11 : i64} {
  func.func @_residual_block_kernel(%arg0: i32, %arg1: memref<2x8x256xf32, #tpu.memory_space<vmem>>, %arg2: memref<24x36xf32, #tpu.memory_space<vmem>>, %arg3: memref<48x1xf32, #tpu.memory_space<vmem>>, %arg4: memref<36x256xf32, #tpu.memory_space<vmem>>, %arg5: memref<2x8x256xf32, #tpu.memory_space<vmem>>) attributes {dimension_semantics = [#tpu.dimension_semantics<arbitrary>], iteration_bounds = array<i64: 1>, scalar_prefetch = 0 : i64, scratch_operands = 0 : i64, tpu.core_type = #tpu.core_type<tc>, window_params = [{transform_indices = @transform_0, window_bounds = array<i64: 2, 8, 256>}, {pipeline_mode = #tpu.pipeline_mode<synchronous>, transform_indices = @transform_1, window_bounds = array<i64: 24, 36>}, {pipeline_mode = #tpu.pipeline_mode<synchronous>, transform_indices = @transform_2, window_bounds = array<i64: 48, 1>}, {pipeline_mode = #tpu.pipeline_mode<synchronous>, transform_indices = @transform_3, window_bounds = array<i64: 36, 256>}, {transform_indices = @transform_4, window_bounds = array<i64: 2, 8, 256>}]} {
    %c0 = arith.constant 0 : index
    %c0_0 = arith.constant 0 : index
    %0 = vector.load %arg2[%c0, %c0_0] : memref<24x36xf32, #tpu.memory_space<vmem>>, vector<4x8xf32>
    %c8 = arith.constant 8 : index
    %c0_1 = arith.constant 0 : index
    %1 = vector.load %arg2[%c8, %c0_1] : memref<24x36xf32, #tpu.memory_space<vmem>>, vector<4x36xf32>
    %c16 = arith.constant 16 : index
    %c0_2 = arith.constant 0 : index
    %2 = vector.load %arg2[%c16, %c0_2] : memref<24x36xf32, #tpu.memory_space<vmem>>, vector<8x4xf32>
    %c0_3 = arith.constant 0 : index
    %c0_4 = arith.constant 0 : index
    %3 = vector.load %arg3[%c0_3, %c0_4] : memref<48x1xf32, #tpu.memory_space<vmem>>, vector<4x1xf32>
    %c8_5 = arith.constant 8 : index
    %c0_6 = arith.constant 0 : index
    %4 = vector.load %arg3[%c8_5, %c0_6] : memref<48x1xf32, #tpu.memory_space<vmem>>, vector<4x1xf32>
    %c16_7 = arith.constant 16 : index
    %c0_8 = arith.constant 0 : index
    %5 = vector.load %arg3[%c16_7, %c0_8] : memref<48x1xf32, #tpu.memory_space<vmem>>, vector<4x1xf32>
    %c24 = arith.constant 24 : index
    %c0_9 = arith.constant 0 : index
    %6 = vector.load %arg3[%c24, %c0_9] : memref<48x1xf32, #tpu.memory_space<vmem>>, vector<4x1xf32>
    %c32 = arith.constant 32 : index
    %c0_10 = arith.constant 0 : index
    %7 = vector.load %arg3[%c32, %c0_10] : memref<48x1xf32, #tpu.memory_space<vmem>>, vector<8x1xf32>
    %c40 = arith.constant 40 : index
    %c0_11 = arith.constant 0 : index
    %8 = vector.load %arg3[%c40, %c0_11] : memref<48x1xf32, #tpu.memory_space<vmem>>, vector<8x1xf32>
    %c0_12 = arith.constant 0 : index
    %c0_13 = arith.constant 0 : index
    %9 = vector.load %arg4[%c0_12, %c0_13] : memref<36x256xf32, #tpu.memory_space<vmem>>, vector<36x256xf32>
    %c0_14 = arith.constant 0 : index
    %c0_15 = arith.constant 0 : index
    %c0_16 = arith.constant 0 : index
    %10 = vector.load %arg1[%c0_14, %c0_15, %c0_16] : memref<2x8x256xf32, #tpu.memory_space<vmem>>, vector<1x8x256xf32>
    %11 = vector.shape_cast %10 : vector<1x8x256xf32> to vector<8x256xf32>
    %cst = arith.constant dense<0.000000e+00> : vector<4x256xf32>
    %12 = tpu.matmul %0, %11, %cst {dimension_numbers = #tpu.dot_dimension_numbers<[1], [0], [0], [1], [0, 0, 1, 1], [], []>} : vector<4x8xf32>, vector<8x256xf32>, vector<4x256xf32> -> vector<4x256xf32>
    %cst_17 = arith.constant dense<0.000000e+00> : vector<4xf32>
    %13 = vector.multi_reduction <add>, %12, %cst_17 [1] : vector<4x256xf32> to vector<4xf32>
    %14 = vector.shape_cast %13 : vector<4xf32> to vector<4x1xf32>
    %cst_18 = arith.constant 2.560000e+02 : f32
    %15 = vector.broadcast %cst_18 : f32 to vector<4x1xf32>
    %16 = arith.divf %14, %15 : vector<4x1xf32>
    %17 = arith.mulf %12, %12 : vector<4x256xf32>
    %cst_19 = arith.constant dense<0.000000e+00> : vector<4xf32>
    %18 = vector.multi_reduction <add>, %17, %cst_19 [1] : vector<4x256xf32> to vector<4xf32>
    %19 = vector.shape_cast %18 : vector<4xf32> to vector<4x1xf32>
    %cst_20 = arith.constant 2.560000e+02 : f32
    %20 = vector.broadcast %cst_20 : f32 to vector<4x1xf32>
    %21 = arith.divf %19, %20 : vector<4x1xf32>
    %22 = arith.mulf %16, %16 : vector<4x1xf32>
    %23 = arith.subf %21, %22 : vector<4x1xf32>
    %cst_21 = arith.constant 0.000000e+00 : f32
    %24 = vector.broadcast %cst_21 : f32 to vector<4x1xf32>
    %25 = arith.maximumf %23, %24 : vector<4x1xf32>
    %26 = vector.broadcast %16 : vector<4x1xf32> to vector<4x256xf32>
    %27 = arith.subf %12, %26 : vector<4x256xf32>
    %cst_22 = arith.constant 9.99999974E-6 : f32
    %28 = vector.broadcast %cst_22 : f32 to vector<4x1xf32>
    %29 = arith.addf %25, %28 : vector<4x1xf32>
    %30 = math.rsqrt %29 : vector<4x1xf32>
    %31 = arith.mulf %3, %30 : vector<4x1xf32>
    %32 = vector.broadcast %31 : vector<4x1xf32> to vector<4x256xf32>
    %33 = arith.mulf %27, %32 : vector<4x256xf32>
    %34 = vector.broadcast %4 : vector<4x1xf32> to vector<4x256xf32>
    %35 = arith.addf %33, %34 : vector<4x256xf32>
    %cst_23 = arith.constant 0.000000e+00 : f32
    %36 = vector.broadcast %cst_23 : f32 to vector<4x256xf32>
    %37 = arith.maximumf %35, %36 : vector<4x256xf32>
    %c17_i32 = arith.constant 17 : i32
    %38 = tpu.dynamic_rotate %37 by %c17_i32 dim 1 : vector<4x256xf32>, i32 -> vector<4x256xf32>
    %c16_i32 = arith.constant 16 : i32
    %39 = tpu.dynamic_rotate %37 by %c16_i32 dim 1 : vector<4x256xf32>, i32 -> vector<4x256xf32>
    %c15_i32 = arith.constant 15 : i32
    %40 = tpu.dynamic_rotate %37 by %c15_i32 dim 1 : vector<4x256xf32>, i32 -> vector<4x256xf32>
    %c1_i32 = arith.constant 1 : i32
    %41 = tpu.dynamic_rotate %37 by %c1_i32 dim 1 : vector<4x256xf32>, i32 -> vector<4x256xf32>
    %c255_i32 = arith.constant 255 : i32
    %42 = tpu.dynamic_rotate %37 by %c255_i32 dim 1 : vector<4x256xf32>, i32 -> vector<4x256xf32>
    %c241_i32 = arith.constant 241 : i32
    %43 = tpu.dynamic_rotate %37 by %c241_i32 dim 1 : vector<4x256xf32>, i32 -> vector<4x256xf32>
    %c240_i32 = arith.constant 240 : i32
    %44 = tpu.dynamic_rotate %37 by %c240_i32 dim 1 : vector<4x256xf32>, i32 -> vector<4x256xf32>
    %c239_i32 = arith.constant 239 : i32
    %45 = tpu.dynamic_rotate %37 by %c239_i32 dim 1 : vector<4x256xf32>, i32 -> vector<4x256xf32>
    %46 = tpu.concatenate %38, %39, %40, %41, %37, %42, %43, %44, %45 in 0 : vector<4x256xf32>, vector<4x256xf32>, vector<4x256xf32>, vector<4x256xf32>, vector<4x256xf32>, vector<4x256xf32>, vector<4x256xf32>, vector<4x256xf32>, vector<4x256xf32> -> vector<36x256xf32>
    %47 = arith.mulf %46, %9 : vector<36x256xf32>
    %cst_24 = arith.constant dense<0.000000e+00> : vector<4x256xf32>
    %48 = tpu.matmul %1, %47, %cst_24 {dimension_numbers = #tpu.dot_dimension_numbers<[1], [0], [0], [1], [0, 0, 1, 1], [], []>} : vector<4x36xf32>, vector<36x256xf32>, vector<4x256xf32> -> vector<4x256xf32>
    %cst_25 = arith.constant dense<0.000000e+00> : vector<4xf32>
    %49 = vector.multi_reduction <add>, %48, %cst_25 [1] : vector<4x256xf32> to vector<4xf32>
    %50 = vector.shape_cast %49 : vector<4xf32> to vector<4x1xf32>
    %cst_26 = arith.constant 2.560000e+02 : f32
    %51 = vector.broadcast %cst_26 : f32 to vector<4x1xf32>
    %52 = arith.divf %50, %51 : vector<4x1xf32>
    %53 = arith.mulf %48, %48 : vector<4x256xf32>
    %cst_27 = arith.constant dense<0.000000e+00> : vector<4xf32>
    %54 = vector.multi_reduction <add>, %53, %cst_27 [1] : vector<4x256xf32> to vector<4xf32>
    %55 = vector.shape_cast %54 : vector<4xf32> to vector<4x1xf32>
    %cst_28 = arith.constant 2.560000e+02 : f32
    %56 = vector.broadcast %cst_28 : f32 to vector<4x1xf32>
    %57 = arith.divf %55, %56 : vector<4x1xf32>
    %58 = arith.mulf %52, %52 : vector<4x1xf32>
    %59 = arith.subf %57, %58 : vector<4x1xf32>
    %cst_29 = arith.constant 0.000000e+00 : f32
    %60 = vector.broadcast %cst_29 : f32 to vector<4x1xf32>
    %61 = arith.maximumf %59, %60 : vector<4x1xf32>
    %62 = vector.broadcast %52 : vector<4x1xf32> to vector<4x256xf32>
    %63 = arith.subf %48, %62 : vector<4x256xf32>
    %cst_30 = arith.constant 9.99999974E-6 : f32
    %64 = vector.broadcast %cst_30 : f32 to vector<4x1xf32>
    %65 = arith.addf %61, %64 : vector<4x1xf32>
    %66 = math.rsqrt %65 : vector<4x1xf32>
    %67 = arith.mulf %5, %66 : vector<4x1xf32>
    %68 = vector.broadcast %67 : vector<4x1xf32> to vector<4x256xf32>
    %69 = arith.mulf %63, %68 : vector<4x256xf32>
    %70 = vector.broadcast %6 : vector<4x1xf32> to vector<4x256xf32>
    %71 = arith.addf %69, %70 : vector<4x256xf32>
    %cst_31 = arith.constant 0.000000e+00 : f32
    %72 = vector.broadcast %cst_31 : f32 to vector<4x256xf32>
    %73 = arith.maximumf %71, %72 : vector<4x256xf32>
    %cst_32 = arith.constant dense<0.000000e+00> : vector<8x256xf32>
    %74 = tpu.matmul %2, %73, %cst_32 {dimension_numbers = #tpu.dot_dimension_numbers<[1], [0], [0], [1], [0, 0, 1, 1], [], []>} : vector<8x4xf32>, vector<4x256xf32>, vector<8x256xf32> -> vector<8x256xf32>
    %cst_33 = arith.constant dense<0.000000e+00> : vector<8xf32>
    %75 = vector.multi_reduction <add>, %74, %cst_33 [1] : vector<8x256xf32> to vector<8xf32>
    %76 = vector.shape_cast %75 : vector<8xf32> to vector<8x1xf32>
    %cst_34 = arith.constant 2.560000e+02 : f32
    %77 = vector.broadcast %cst_34 : f32 to vector<8x1xf32>
    %78 = arith.divf %76, %77 : vector<8x1xf32>
    %79 = arith.mulf %74, %74 : vector<8x256xf32>
    %cst_35 = arith.constant dense<0.000000e+00> : vector<8xf32>
    %80 = vector.multi_reduction <add>, %79, %cst_35 [1] : vector<8x256xf32> to vector<8xf32>
    %81 = vector.shape_cast %80 : vector<8xf32> to vector<8x1xf32>
    %cst_36 = arith.constant 2.560000e+02 : f32
    %82 = vector.broadcast %cst_36 : f32 to vector<8x1xf32>
    %83 = arith.divf %81, %82 : vector<8x1xf32>
    %84 = arith.mulf %78, %78 : vector<8x1xf32>
    %85 = arith.subf %83, %84 : vector<8x1xf32>
    %cst_37 = arith.constant 0.000000e+00 : f32
    %86 = vector.broadcast %cst_37 : f32 to vector<8x1xf32>
    %87 = arith.maximumf %85, %86 : vector<8x1xf32>
    %88 = vector.broadcast %78 : vector<8x1xf32> to vector<8x256xf32>
    %89 = arith.subf %74, %88 : vector<8x256xf32>
    %cst_38 = arith.constant 9.99999974E-6 : f32
    %90 = vector.broadcast %cst_38 : f32 to vector<8x1xf32>
    %91 = arith.addf %87, %90 : vector<8x1xf32>
    %92 = math.rsqrt %91 : vector<8x1xf32>
    %93 = arith.mulf %7, %92 : vector<8x1xf32>
    %94 = vector.broadcast %93 : vector<8x1xf32> to vector<8x256xf32>
    %95 = arith.mulf %89, %94 : vector<8x256xf32>
    %96 = vector.broadcast %8 : vector<8x1xf32> to vector<8x256xf32>
    %97 = arith.addf %95, %96 : vector<8x256xf32>
    %98 = arith.addf %97, %11 : vector<8x256xf32>
    %cst_39 = arith.constant 0.000000e+00 : f32
    %99 = vector.broadcast %cst_39 : f32 to vector<8x256xf32>
    %100 = arith.maximumf %98, %99 : vector<8x256xf32>
    %c0_40 = arith.constant 0 : index
    %c0_41 = arith.constant 0 : index
    %c0_42 = arith.constant 0 : index
    %101 = vector.load %arg5[%c0_40, %c0_41, %c0_42] : memref<2x8x256xf32, #tpu.memory_space<vmem>>, vector<1x8x256xf32>
    %102 = vector.shape_cast %101 : vector<1x8x256xf32> to vector<8x256xf32>
    %103 = vector.shape_cast %100 : vector<8x256xf32> to vector<1x8x256xf32>
    tpu.vector_store %arg5[%c0_40, %c0_41, %c0_42], %103 {strides = array<i32>} : memref<2x8x256xf32, #tpu.memory_space<vmem>>, vector<1x8x256xf32>,
    %c1 = arith.constant 1 : index
    %c0_43 = arith.constant 0 : index
    %c0_44 = arith.constant 0 : index
    %104 = vector.load %arg1[%c1, %c0_43, %c0_44] : memref<2x8x256xf32, #tpu.memory_space<vmem>>, vector<1x8x256xf32>
    %105 = vector.shape_cast %104 : vector<1x8x256xf32> to vector<8x256xf32>
    %cst_45 = arith.constant dense<0.000000e+00> : vector<4x256xf32>
    %106 = tpu.matmul %0, %105, %cst_45 {dimension_numbers = #tpu.dot_dimension_numbers<[1], [0], [0], [1], [0, 0, 1, 1], [], []>} : vector<4x8xf32>, vector<8x256xf32>, vector<4x256xf32> -> vector<4x256xf32>
    %cst_46 = arith.constant dense<0.000000e+00> : vector<4xf32>
    %107 = vector.multi_reduction <add>, %106, %cst_46 [1] : vector<4x256xf32> to vector<4xf32>
    %108 = vector.shape_cast %107 : vector<4xf32> to vector<4x1xf32>
    %cst_47 = arith.constant 2.560000e+02 : f32
    %109 = vector.broadcast %cst_47 : f32 to vector<4x1xf32>
    %110 = arith.divf %108, %109 : vector<4x1xf32>
    %111 = arith.mulf %106, %106 : vector<4x256xf32>
    %cst_48 = arith.constant dense<0.000000e+00> : vector<4xf32>
    %112 = vector.multi_reduction <add>, %111, %cst_48 [1] : vector<4x256xf32> to vector<4xf32>
    %113 = vector.shape_cast %112 : vector<4xf32> to vector<4x1xf32>
    %cst_49 = arith.constant 2.560000e+02 : f32
    %114 = vector.broadcast %cst_49 : f32 to vector<4x1xf32>
    %115 = arith.divf %113, %114 : vector<4x1xf32>
    %116 = arith.mulf %110, %110 : vector<4x1xf32>
    %117 = arith.subf %115, %116 : vector<4x1xf32>
    %cst_50 = arith.constant 0.000000e+00 : f32
    %118 = vector.broadcast %cst_50 : f32 to vector<4x1xf32>
    %119 = arith.maximumf %117, %118 : vector<4x1xf32>
    %120 = vector.broadcast %110 : vector<4x1xf32> to vector<4x256xf32>
    %121 = arith.subf %106, %120 : vector<4x256xf32>
    %cst_51 = arith.constant 9.99999974E-6 : f32
    %122 = vector.broadcast %cst_51 : f32 to vector<4x1xf32>
    %123 = arith.addf %119, %122 : vector<4x1xf32>
    %124 = math.rsqrt %123 : vector<4x1xf32>
    %125 = arith.mulf %3, %124 : vector<4x1xf32>
    %126 = vector.broadcast %125 : vector<4x1xf32> to vector<4x256xf32>
    %127 = arith.mulf %121, %126 : vector<4x256xf32>
    %128 = vector.broadcast %4 : vector<4x1xf32> to vector<4x256xf32>
    %129 = arith.addf %127, %128 : vector<4x256xf32>
    %cst_52 = arith.constant 0.000000e+00 : f32
    %130 = vector.broadcast %cst_52 : f32 to vector<4x256xf32>
    %131 = arith.maximumf %129, %130 : vector<4x256xf32>
    %c17_i32_53 = arith.constant 17 : i32
    %132 = tpu.dynamic_rotate %131 by %c17_i32_53 dim 1 : vector<4x256xf32>, i32 -> vector<4x256xf32>
    %c16_i32_54 = arith.constant 16 : i32
    %133 = tpu.dynamic_rotate %131 by %c16_i32_54 dim 1 : vector<4x256xf32>, i32 -> vector<4x256xf32>
    %c15_i32_55 = arith.constant 15 : i32
    %134 = tpu.dynamic_rotate %131 by %c15_i32_55 dim 1 : vector<4x256xf32>, i32 -> vector<4x256xf32>
    %c1_i32_56 = arith.constant 1 : i32
    %135 = tpu.dynamic_rotate %131 by %c1_i32_56 dim 1 : vector<4x256xf32>, i32 -> vector<4x256xf32>
    %c255_i32_57 = arith.constant 255 : i32
    %136 = tpu.dynamic_rotate %131 by %c255_i32_57 dim 1 : vector<4x256xf32>, i32 -> vector<4x256xf32>
    %c241_i32_58 = arith.constant 241 : i32
    %137 = tpu.dynamic_rotate %131 by %c241_i32_58 dim 1 : vector<4x256xf32>, i32 -> vector<4x256xf32>
    %c240_i32_59 = arith.constant 240 : i32
    %138 = tpu.dynamic_rotate %131 by %c240_i32_59 dim 1 : vector<4x256xf32>, i32 -> vector<4x256xf32>
    %c239_i32_60 = arith.constant 239 : i32
    %139 = tpu.dynamic_rotate %131 by %c239_i32_60 dim 1 : vector<4x256xf32>, i32 -> vector<4x256xf32>
    %140 = tpu.concatenate %132, %133, %134, %135, %131, %136, %137, %138, %139 in 0 : vector<4x256xf32>, vector<4x256xf32>, vector<4x256xf32>, vector<4x256xf32>, vector<4x256xf32>, vector<4x256xf32>, vector<4x256xf32>, vector<4x256xf32>, vector<4x256xf32> -> vector<36x256xf32>
    %141 = arith.mulf %140, %9 : vector<36x256xf32>
    %cst_61 = arith.constant dense<0.000000e+00> : vector<4x256xf32>
    %142 = tpu.matmul %1, %141, %cst_61 {dimension_numbers = #tpu.dot_dimension_numbers<[1], [0], [0], [1], [0, 0, 1, 1], [], []>} : vector<4x36xf32>, vector<36x256xf32>, vector<4x256xf32> -> vector<4x256xf32>
    %cst_62 = arith.constant dense<0.000000e+00> : vector<4xf32>
    %143 = vector.multi_reduction <add>, %142, %cst_62 [1] : vector<4x256xf32> to vector<4xf32>
    %144 = vector.shape_cast %143 : vector<4xf32> to vector<4x1xf32>
    %cst_63 = arith.constant 2.560000e+02 : f32
    %145 = vector.broadcast %cst_63 : f32 to vector<4x1xf32>
    %146 = arith.divf %144, %145 : vector<4x1xf32>
    %147 = arith.mulf %142, %142 : vector<4x256xf32>
    %cst_64 = arith.constant dense<0.000000e+00> : vector<4xf32>
    %148 = vector.multi_reduction <add>, %147, %cst_64 [1] : vector<4x256xf32> to vector<4xf32>
    %149 = vector.shape_cast %148 : vector<4xf32> to vector<4x1xf32>
    %cst_65 = arith.constant 2.560000e+02 : f32
    %150 = vector.broadcast %cst_65 : f32 to vector<4x1xf32>
    %151 = arith.divf %149, %150 : vector<4x1xf32>
    %152 = arith.mulf %146, %146 : vector<4x1xf32>
    %153 = arith.subf %151, %152 : vector<4x1xf32>
    %cst_66 = arith.constant 0.000000e+00 : f32
    %154 = vector.broadcast %cst_66 : f32 to vector<4x1xf32>
    %155 = arith.maximumf %153, %154 : vector<4x1xf32>
    %156 = vector.broadcast %146 : vector<4x1xf32> to vector<4x256xf32>
    %157 = arith.subf %142, %156 : vector<4x256xf32>
    %cst_67 = arith.constant 9.99999974E-6 : f32
    %158 = vector.broadcast %cst_67 : f32 to vector<4x1xf32>
    %159 = arith.addf %155, %158 : vector<4x1xf32>
    %160 = math.rsqrt %159 : vector<4x1xf32>
    %161 = arith.mulf %5, %160 : vector<4x1xf32>
    %162 = vector.broadcast %161 : vector<4x1xf32> to vector<4x256xf32>
    %163 = arith.mulf %157, %162 : vector<4x256xf32>
    %164 = vector.broadcast %6 : vector<4x1xf32> to vector<4x256xf32>
    %165 = arith.addf %163, %164 : vector<4x256xf32>
    %cst_68 = arith.constant 0.000000e+00 : f32
    %166 = vector.broadcast %cst_68 : f32 to vector<4x256xf32>
    %167 = arith.maximumf %165, %166 : vector<4x256xf32>
    %cst_69 = arith.constant dense<0.000000e+00> : vector<8x256xf32>
    %168 = tpu.matmul %2, %167, %cst_69 {dimension_numbers = #tpu.dot_dimension_numbers<[1], [0], [0], [1], [0, 0, 1, 1], [], []>} : vector<8x4xf32>, vector<4x256xf32>, vector<8x256xf32> -> vector<8x256xf32>
    %cst_70 = arith.constant dense<0.000000e+00> : vector<8xf32>
    %169 = vector.multi_reduction <add>, %168, %cst_70 [1] : vector<8x256xf32> to vector<8xf32>
    %170 = vector.shape_cast %169 : vector<8xf32> to vector<8x1xf32>
    %cst_71 = arith.constant 2.560000e+02 : f32
    %171 = vector.broadcast %cst_71 : f32 to vector<8x1xf32>
    %172 = arith.divf %170, %171 : vector<8x1xf32>
    %173 = arith.mulf %168, %168 : vector<8x256xf32>
    %cst_72 = arith.constant dense<0.000000e+00> : vector<8xf32>
    %174 = vector.multi_reduction <add>, %173, %cst_72 [1] : vector<8x256xf32> to vector<8xf32>
    %175 = vector.shape_cast %174 : vector<8xf32> to vector<8x1xf32>
    %cst_73 = arith.constant 2.560000e+02 : f32
    %176 = vector.broadcast %cst_73 : f32 to vector<8x1xf32>
    %177 = arith.divf %175, %176 : vector<8x1xf32>
    %178 = arith.mulf %172, %172 : vector<8x1xf32>
    %179 = arith.subf %177, %178 : vector<8x1xf32>
    %cst_74 = arith.constant 0.000000e+00 : f32
    %180 = vector.broadcast %cst_74 : f32 to vector<8x1xf32>
    %181 = arith.maximumf %179, %180 : vector<8x1xf32>
    %182 = vector.broadcast %172 : vector<8x1xf32> to vector<8x256xf32>
    %183 = arith.subf %168, %182 : vector<8x256xf32>
    %cst_75 = arith.constant 9.99999974E-6 : f32
    %184 = vector.broadcast %cst_75 : f32 to vector<8x1xf32>
    %185 = arith.addf %181, %184 : vector<8x1xf32>
    %186 = math.rsqrt %185 : vector<8x1xf32>
    %187 = arith.mulf %7, %186 : vector<8x1xf32>
    %188 = vector.broadcast %187 : vector<8x1xf32> to vector<8x256xf32>
    %189 = arith.mulf %183, %188 : vector<8x256xf32>
    %190 = vector.broadcast %8 : vector<8x1xf32> to vector<8x256xf32>
    %191 = arith.addf %189, %190 : vector<8x256xf32>
    %192 = arith.addf %191, %105 : vector<8x256xf32>
    %cst_76 = arith.constant 0.000000e+00 : f32
    %193 = vector.broadcast %cst_76 : f32 to vector<8x256xf32>
    %194 = arith.maximumf %192, %193 : vector<8x256xf32>
    %c1_77 = arith.constant 1 : index
    %c0_78 = arith.constant 0 : index
    %c0_79 = arith.constant 0 : index
    %195 = vector.load %arg5[%c1_77, %c0_78, %c0_79] : memref<2x8x256xf32, #tpu.memory_space<vmem>>, vector<1x8x256xf32>
    %196 = vector.shape_cast %195 : vector<1x8x256xf32> to vector<8x256xf32>
    %197 = vector.shape_cast %194 : vector<8x256xf32> to vector<1x8x256xf32>
    tpu.vector_store %arg5[%c1_77, %c0_78, %c0_79], %197 {strides = array<i32>} : memref<2x8x256xf32, #tpu.memory_space<vmem>>, vector<1x8x256xf32>,
    return
  }
  func.func @transform_0(%arg0: i32) -> (i32, i32, i32) {
    %c0_i32 = arith.constant 0 : i32
    %c0_i32_0 = arith.constant 0 : i32
    %c0_i32_1 = arith.constant 0 : i32
    return %arg0, %c0_i32, %c0_i32_0 : i32, i32, i32
  }
  func.func @transform_1(%arg0: i32) -> (i32, i32) {
    %c0_i32 = arith.constant 0 : i32
    %c0_i32_0 = arith.constant 0 : i32
    %c0_i32_1 = arith.constant 0 : i32
    return %c0_i32, %c0_i32_0 : i32, i32
  }
  func.func @transform_2(%arg0: i32) -> (i32, i32) {
    %c0_i32 = arith.constant 0 : i32
    %c0_i32_0 = arith.constant 0 : i32
    %c0_i32_1 = arith.constant 0 : i32
    return %c0_i32, %c0_i32_0 : i32, i32
  }
  func.func @transform_3(%arg0: i32) -> (i32, i32) {
    %c0_i32 = arith.constant 0 : i32
    %c0_i32_0 = arith.constant 0 : i32
    %c0_i32_1 = arith.constant 0 : i32
    return %c0_i32, %c0_i32_0 : i32, i32
  }
  func.func @transform_4(%arg0: i32) -> (i32, i32, i32) {
    %c0_i32 = arith.constant 0 : i32
    %c0_i32_0 = arith.constant 0 : i32
    %c0_i32_1 = arith.constant 0 : i32
    return %arg0, %c0_i32, %c0_i32_0 : i32, i32, i32
  }
}

</mosaic_0001>

<bundles_post_ra>
// kernel: tpu_custom_call.1
= control target key start
LH: loop header
LB: loop body
LE: loop exit
PB: predicated region body
PF: predicated region fallthrough
CT: control target
= control target key end

     0   :  { %9 = vsyncpa [#allocation3], 0  ;;  %s1489_s0 = inlined_call_operand.vmem [shape: f32[2,8,256], index: 0, kind: input, shape index: {}]   ;;  %s1490_s1 = inlined_call_operand.hbm [shape: f32[24,36], index: 1, kind: input, shape index: {}]   ;;  %s1491_s2 = inlined_call_operand.vmem [shape: f32[48,1], index: 2, kind: input, shape index: {}]   ;;  %s1492_s3 = inlined_call_operand.hbm [shape: f32[36,256], index: 3, kind: input, shape index: {}]   ;;  %s1493_s4 = inlined_call_operand.hbm [shape: f32[2,8,256], index: 4, kind: output, shape index: {}]  }
   0x1   :  { %10 = vsyncpa [#allocation6], 0 }
   0x2   :  { %11 = vsyncpa [#allocation4], 0  ;;  %s1090_s15 = smov [#allocation2]   ;;  %s1018_s19 = scalar_lea.hbm %s1490_s1, 384 }
   0x3   :  { %s19_s16 = sshll.u32 %s1090_s15, 4  ;;  %p1019_p0 = scmp.ne.s32.totalorder %s1490_s1, %s1018_s19  ;;  %s20_s16 = int_to_ptr.vmem [resolvable:$true] %s19_s16 }
   0x4   :  { %p1022_p1 = scmp.lt.u32.totalorder %s1018_s19, %s1490_s1 }
   0x6   :  { %p1024_p2 = pnand %p1022_p1, %p1019_p0 }
   0x8   :  { %1027 = shalt.err (!%p1024_p2)
}
   0x9   :  { %s1028_s24 = scalar_lea.vmem %s20_s16, 384  ;;  %p1033_p4 = scmp.lt.s32.totalorder %s20_s16, %s20_s16 }
   0xa   :  { %p1029_p3 = scmp.ne.s32.totalorder %s20_s16, %s1028_s24  ;;  %p1034_p5 = scmp.lt.s32.totalorder %s1028_s24, %s1028_s24 }
   0xc   :  { %p1035_p6 = por %p1034_p5, %p1033_p4 }
   0xe   :  { %p1036_p7 = pnand %p1035_p6, %p1029_p3 }
  0x10   :  { %1039 = shalt.err (!%p1036_p7)
}
  0x11   :  { %s1091_s25 = smov 128   ;;  %s1092_s26 = smov 8  }
  0x12   :  { %25 = dma.hbm_to_vmem [thread:$0]  %s1490_s1, 384, %s20_s16, [#allocation3], %s1091_s25, %s1091_s25, %s1092_s26  }
  0x13   :  { %s1093_s29 = smov [#allocation5]   ;;  %s1040_s7 = scalar_lea.hbm %s1492_s3, 1280 }
  0x14   :  { %s33_s30 = sshll.u32 %s1093_s29, 4  ;;  %p1041_p8 = scmp.ne.s32.totalorder %s1492_s3, %s1040_s7  ;;  %s34_s30 = int_to_ptr.vmem [resolvable:$true] %s33_s30 }
  0x15   :  { %p1044_p9 = scmp.lt.u32.totalorder %s1040_s7, %s1492_s3 }
  0x17   :  { %p1046_p10 = pnand %p1044_p9, %p1041_p8 }
  0x19   :  { %1049 = shalt.err (!%p1046_p10)
}
  0x1a   :  { %s1050_s12 = scalar_lea.vmem %s34_s30, 1280  ;;  %p1055_p12 = scmp.lt.s32.totalorder %s34_s30, %s34_s30 }
  0x1b   :  { %p1051_p11 = scmp.ne.s32.totalorder %s34_s30, %s1050_s12  ;;  %p1056_p13 = scmp.lt.s32.totalorder %s1050_s12, %s1050_s12 }
  0x1d   :  { %p1057_p0 = por %p1056_p13, %p1055_p12 }
  0x1f   :  { %p1058_p1 = pnand %p1057_p0, %p1051_p11 }
  0x21   :  { %1061 = shalt.err (!%p1058_p1)
}
  0x22   :  { %s1094_s1 = smov 256   ;;  %s1095_s13 = smov 16  }
  0x23   :  { %39 = dma.hbm_to_vmem [thread:$0]  %s1492_s3, 1280, %s34_s30, [#allocation6], %s1094_s1, %s1094_s1, %s1095_s13  }
  0x24   :  { %1084 = dma.done.wait [#allocation3], 384  }
  0x25   :  { %1085 = vsyncadd [#allocation3], 4294966912 }
  0x26   :  { %1086 = dma.done.wait [#allocation6], 1280  }
  0x27   :  { %1087 = vsyncadd [#allocation6], 4294966016  ;;  %v1096_v0 = vmov 0.0   ;;  %v1163_v1 = vld [vmem:[%s1489_s0 + $0x8] sm:$0xff]  ;;  %v1168_v2 = vld [vmem:[%s1489_s0] sm:$0xff]  ;;  %vm67_vm0 = vcmask 64512   ;;  %v186_v38 = vlaneseq }
  0x28   :  { %135 = vmatprep.mubr.f32.mxu1 %v1096_v0  ;;  %475 = vmatprep.mubr.f32.mxu0 %v1096_v0  ;;  %v1170_v3 = vld [vmem:[#allocation2] sm:$0xf]  ;;  %vm142_vm1 = vcmask 1043456   ;;  %v1097_v14 = vmov 0   ;;  %v50_v28 = vld [vmem:[%s1491_s2 + $0x8] sm:$0xf] }
  0x29   :  { %71 = vmatprep.subr.mxu1 %v1163_v1  ;;  %1004 = vset.pattern.permute.xlu1 %v1097_v14  ;;  %v1184_v25 = vld [vmem:[%s1491_s2] sm:$0xf]  ;;  %s1098_s23 = smov 1   ;;  %s1099_s24 = smov 15   ;;  %v1230_v41 = vand.u32 127, %v186_v38  ;;  %v1248_v55 = vld [vmem:[#allocation5] sm:$0xff] }
  0x2a   :  { %72 = vmatpush1.msra.mxu1 %v1168_v2  ;;  %1005 = vset.pattern.permute.xlu0 %v1097_v14  ;;  %s1100_s25 = smov 127   ;;  %s1101_s26 = smov 17   ;;  %v1250_v58 = vld [vmem:[#allocation5 + $0x8] sm:$0xff]  ;;  %v1254_v61 = vld [vmem:[#allocation5 + $0x10] sm:$0xff]  ;;  %v1256_v62 = vld [vmem:[#allocation5 + $0x18] sm:$0xff]  ;;  %vm282_vm10 = vcmask 293888  }
  0x2b   :  { %956 = vmatmul.mubr.msk.f32.vlgmr.msra.gmra.mrb[0].mxu1 %vm67_vm0, %v1170_v3  ;;  %s1102_s27 = smov 112   ;;  %s1103_s28 = smov 113   ;;  %vm195_vm2 = vcmp.lt.s32.totalorder %v1230_v41, 16  ;;  %vm209_vm3 = vcmp.lt.s32.totalorder %v1230_v41, 1  ;;  %vm188_vm4 = vcmp.lt.s32.totalorder %v1230_v41, 17  ;;  %vm202_vm5 = vcmp.lt.s32.totalorder %v1230_v41, 15 }
  0x2c   :  { %356 = vmatprep.mubr.f32.mxu1 %v1096_v0  ;;  %s1104_s29 = smov 111   ;;  %vm216_vm6 = vcmp.lt.s32.totalorder %v1230_v41, 127  ;;  %vm230_vm7 = vcmp.lt.s32.totalorder %v1230_v41, 112  ;;  %vm223_vm8 = vcmp.lt.s32.totalorder %v1230_v41, 113  ;;  %vm237_vm9 = vcmp.lt.s32.totalorder %v1230_v41, 111  ;;  %s1105_s16 = smov [#allocation7]  }
  0x2d   :  { %vm401_vm11 = vcmask 31744   ;;  %s943_s17 = sshll.u32 %s1105_s16, 4  ;;  %s944_s17 = int_to_ptr.vmem [resolvable:$true] %s943_s17 }
  0x2e   :  { %p1067_p3 = scmp.lt.s32.totalorder %s944_s17, %s944_s17 }
  0xfe   :  { %v137_v4 = vpop.f32.mrb[0].mxu1 }
  0xff   :  { %v150_v5 = vmul.f32 %v137_v4, %v137_v4  ;;  %v139_v6 = vpop.f32.mrb[1].mxu1  ;;  %v143_v7 = vsel %vm142_vm1, %v137_v4, 0.0 }
 0x100   :  { %v151_v8 = vmul.f32 %v139_v6, %v139_v6  ;;  %v144_v9 = vsel %vm142_vm1, %v139_v6, 0.0 }
 0x101   :  { %v145_v10 = vadd.f32 %v144_v9, %v143_v7  ;;  %v152_v11 = vsel %vm142_vm1, %v150_v5, 0.0 }
 0x102   :  { %v153_v12 = vsel %vm142_vm1, %v151_v8, 0.0 }
 0x103   :  { %146 = vadd.xlane.f32.xlu0 %v145_v10  ;;  %v154_v13 = vadd.f32 %v153_v12, %v152_v11 }
 0x107   :  { %155 = vadd.xlane.f32.xlu0 %v154_v13 }
 0x190   :  { %v147_v15 = vpop.xlane.xlu0 %146 }
 0x191   :  { %v149_v16 = vmul.f32 0.00390625, %v147_v15 }
 0x193   :  { %v161_v17 = vsub.f32 %v137_v4, %v149_v16  ;;  %v162_v18 = vsub.f32 %v139_v6, %v149_v16  ;;  %v158_v20 = vmul.f32 %v149_v16, %v149_v16 }
 0x194   :  { %v156_v19 = vpop.xlane.xlu0 %155 }
 0x195   :  { %v157_v21 = vmul.f32 0.00390625, %v156_v19 }
 0x197   :  { %v159_v22 = vsub.f32 %v157_v21, %v158_v20 }
 0x199   :  { %v160_v23 = vmax.f32 %v159_v22, 0.0 }
 0x19b   :  { %v163_v24 = vadd.f32 1e-05, %v160_v23 }
 0x19d   :  { %1006 = vrsqrt.f32 %v163_v24  ;;  %v1279_v24 = vld [vmem:[#allocation5 + $0x20] sm:$0xff] }
 0x1a7   :  { %v1007_v26 = vpop.eup %1006 }
 0x1a8   :  { %v165_v27 = vmul.f32 %v1007_v26, %v1184_v25 }
 0x1aa   :  { %168 = vperm.xlu1 %1004, %v165_v27  }
 0x1ae   :  { %175 = vperm.xlu1 %1004, %v50_v28  }
 0x229   :  { %v169_v29 = vpop.permute.xlu1 %168 }
 0x22a   :  { %v171_v30 = vmul.f32 %v169_v29, %v161_v17  ;;  %v172_v31 = vmul.f32 %v169_v29, %v162_v18 }
 0x22d   :  { %v1190_v32 = vpop.permute.xlu1 %175 }
 0x22e   :  { %v178_v33 = vadd.f32 %v1190_v32, %v171_v30  ;;  %v179_v34 = vadd.f32 %v1190_v32, %v172_v31  ;;  %v1285_v30 = vld [vmem:[#allocation5 + $0x30] sm:$0xff]  ;;  %v1287_v31 = vld [vmem:[#allocation5 + $0x38] sm:$0xff] }
 0x230   :  { %v1194_v35 = vmax.f32 %v178_v33, 0.0  ;;  %v1196_v36 = vmax.f32 %v179_v34, 0.0  ;;  %v1289_v34 = vld [vmem:[#allocation5 + $0x28] sm:$0xff] }
 0x232   :  { %193 = vrot.lane.b32.xlu1 %v1196_v36, %s1095_s13  ;;  %191 = vrot.lane.b32.xlu0 %v1194_v35, %s1095_s13 }
 0x236   :  { %205 = vrot.lane.b32.xlu1 %v1194_v35, %s1098_s23  ;;  %200 = vrot.lane.b32.xlu0 %v1196_v36, %s1099_s24 }
 0x23a   :  { %207 = vrot.lane.b32.xlu1 %v1196_v36, %s1098_s23  ;;  %214 = vrot.lane.b32.xlu0 %v1196_v36, %s1100_s25 }
 0x23e   :  { %182 = vrot.lane.b32.xlu1 %v1194_v35, %s1101_s26  ;;  %228 = vrot.lane.b32.xlu0 %v1196_v36, %s1102_s27 }
 0x242   :  { %184 = vrot.lane.b32.xlu1 %v1196_v36, %s1101_s26  ;;  %221 = vrot.lane.b32.xlu0 %v1196_v36, %s1103_s28 }
 0x246   :  { %198 = vrot.lane.b32.xlu1 %v1194_v35, %s1099_s24  ;;  %235 = vrot.lane.b32.xlu0 %v1196_v36, %s1104_s29 }
 0x24a   :  { %212 = vrot.lane.b32.xlu1 %v1194_v35, %s1100_s25 }
 0x24e   :  { %226 = vrot.lane.b32.xlu1 %v1194_v35, %s1102_s27 }
 0x252   :  { %219 = vrot.lane.b32.xlu1 %v1194_v35, %s1103_s28 }
 0x256   :  { %233 = vrot.lane.b32.xlu1 %v1194_v35, %s1104_s29 }
 0x2a4   :  { %v194_v37 = vpop.permute.xlu1 %193  ;;  %v192_v40 = vpop.permute.xlu0 %191 }
 0x2a5   :  { %v196_v45 = vsel %vm195_vm2, %v192_v40, %v194_v37  ;;  %v197_v46 = vsel %vm195_vm2, %v194_v37, %v192_v40 }
 0x2a6   :  { %v242_v52 = vrot.slane %v197_v46, 4  ;;  %v243_v53 = vrot.slane %v196_v45, 4 }
 0x2a8   :  { %v206_v39 = vpop.permute.xlu1 %205  ;;  %v201_v43 = vpop.permute.xlu0 %200 }
 0x2ac   :  { %v208_v42 = vpop.permute.xlu1 %207  ;;  %v215_v54 = vpop.permute.xlu0 %214 }
 0x2ad   :  { %v210_v48 = vsel %vm209_vm3, %v206_v39, %v208_v42  ;;  %v211_v49 = vsel %vm209_vm3, %v208_v42, %v206_v39 }
 0x2ae   :  { %v248_v56 = vrot.slane %v211_v49, 4  ;;  %v249_v57 = vrot.slane %v210_v48, 4 }
 0x2b0   :  { %v183_v44 = vpop.permute.xlu1 %182  ;;  %v229_v12 = vpop.permute.xlu0 %228 }
 0x2b4   :  { %v185_v47 = vpop.permute.xlu1 %184  ;;  %v222_v23 = vpop.permute.xlu0 %221 }
 0x2b5   :  { %v189_v50 = vsel %vm188_vm4, %v183_v44, %v185_v47  ;;  %v190_v51 = vsel %vm188_vm4, %v185_v47, %v183_v44 }
 0x2b6   :  { %v264_v59 = vsel %vm142_vm1, %v190_v51, %v242_v52  ;;  %v265_v60 = vsel %vm142_vm1, %v189_v50, %v243_v53  ;;  %v1307_v51 = vld [vmem:[#allocation5 + $0x40] sm:$0xf] }
 0x2b7   :  { %v272_v8 = vmul.f32 %v264_v59, %v1248_v55  ;;  %v273_v9 = vmul.f32 %v265_v60, %v1250_v58 }
 0x2b8   :  { %v199_v63 = vpop.permute.xlu1 %198  ;;  %v236_v45 = vpop.permute.xlu0 %235 }
 0x2b9   :  { %v203_v4 = vsel %vm202_vm5, %v199_v63, %v201_v43  ;;  %v204_v5 = vsel %vm202_vm5, %v201_v43, %v199_v63  ;;  %v1301_v43 = vld [vmem:[#allocation5 + $0x48] sm:$0xf] }
 0x2ba   :  { %v266_v6 = vsel %vm142_vm1, %v204_v5, %v248_v56  ;;  %v267_v7 = vsel %vm142_vm1, %v203_v4, %v249_v57 }
 0x2bb   :  { %v274_v10 = vmul.f32 %v266_v6, %v1254_v61  ;;  %v275_v11 = vmul.f32 %v267_v7, %v1256_v62 }
 0x2bc   :  { %v213_v13 = vpop.permute.xlu1 %212 }
 0x2bd   :  { %v974_v14 = vpack.c.bf16 %v274_v10, %v272_v8  ;;  %v217_v15 = vsel %vm216_vm6, %v213_v13, %v215_v54  ;;  %v218_v16 = vsel %vm216_vm6, %v215_v54, %v213_v13  ;;  %v972_v17 = vpack.c.bf16 %v275_v11, %v273_v9  ;;  %v1313_v54 = vld [vmem:[#allocation2 + $0x8] sm:$0xf]  ;;  %v52_v9 = vld [vmem:[%s1491_s2 + $0x18] sm:$0xf] }
 0x2be   :  { %v254_v18 = vrot.slane %v217_v15, 4  ;;  %v255_v19 = vrot.slane %v218_v16, 4 }
 0x2bf   :  { %973 = vmatprep.subr.bf16.mxu1 %v972_v17 }
 0x2c0   :  { %v227_v20 = vpop.permute.xlu1 %226  ;;  %975 = vmatpush1.bf16.msra.mxu1 %v974_v14  ;;  %v268_v26 = vsel %vm142_vm1, %v1194_v35, %v254_v18  ;;  %v269_v27 = vsel %vm142_vm1, %v1196_v36, %v255_v19 }
 0x2c1   :  { %v231_v21 = vsel %vm230_vm7, %v227_v20, %v229_v12  ;;  %v232_v22 = vsel %vm230_vm7, %v229_v12, %v227_v20  ;;  %v276_v36 = vmul.f32 %v268_v26, %v1279_v24  ;;  %v277_v44 = vmul.f32 %v269_v27, %v1289_v34  ;;  %v1329_v20 = vld [vmem:[%s1491_s2 + $0x10] sm:$0xf] }
 0x2c2   :  { %v260_v28 = vrot.slane %v231_v21, 4  ;;  %v261_v29 = vrot.slane %v232_v22, 4 }
 0x2c4   :  { %v220_v33 = vpop.permute.xlu1 %219 }
 0x2c5   :  { %v224_v37 = vsel %vm223_vm8, %v220_v33, %v222_v23  ;;  %v225_v38 = vsel %vm223_vm8, %v222_v23, %v220_v33 }
 0x2c6   :  { %v270_v35 = vsel %vm142_vm1, %v224_v37, %v260_v28  ;;  %v271_v39 = vsel %vm142_vm1, %v225_v38, %v261_v29 }
 0x2c7   :  { %v278_v40 = vmul.f32 %v270_v35, %v1285_v30  ;;  %v279_v42 = vmul.f32 %v271_v39, %v1287_v31  ;;  %v1336_v35 = vld [vmem:[#allocation2 + $0x10] sm:$0xff]  ;;  %v1341_v39 = vld [vmem:[%s1489_s0 + $0x18] sm:$0xff] }
 0x2c8   :  { %v234_v46 = vpop.permute.xlu1 %233 }
 0x2c9   :  { %v978_v47 = vpack.c.bf16 %v278_v40, %v276_v36  ;;  %v239_v48 = vsel %vm237_vm9, %v236_v45, %v234_v46  ;;  %v976_v49 = vpack.c.bf16 %v279_v42, %v277_v44  ;;  %v238_v52 = vsel %vm237_vm9, %v234_v46, %v236_v45  ;;  %v1347_v36 = vld [vmem:[%s1489_s0 + $0x10] sm:$0xff] }
 0x2ca   :  { %v281_v50 = vmul.f32 %v239_v48, %v1301_v43  ;;  %v280_v53 = vmul.f32 %v238_v52, %v1307_v51 }
 0x2cb   :  { %977 = vmatprep.subr.bf16.mxu1 %v976_v49 }
 0x2cc   :  { %979 = vmatpush1.bf16.msra.mxu1 %v978_v47 }
 0x2cd   :  { %957 = vmatprep.subr.msk.mxu1 %vm142_vm1, %v281_v50 }
 0x2d0   :  { %958 = vmatpush1.msk.msra.mxu1 %vm142_vm1, %v280_v53 }
 0x2d1   :  { %959 = vmatmul.mubr.msk.f32.vlgmr.msra.gmra.mrb[2].mxu1 %vm282_vm10, %v1313_v54 }
 0x2d2   :  { %897 = vmatprep.mubr.f32.mxu1 %v1096_v0 }
 0x3a4   :  { %v358_v56 = vpop.f32.mrb[2].mxu1 }
 0x3a5   :  { %v369_v57 = vmul.f32 %v358_v56, %v358_v56  ;;  %v360_v59 = vpop.f32.mrb[3].mxu1  ;;  %v363_v60 = vsel %vm142_vm1, %v358_v56, 0.0 }
 0x3a6   :  { %v370_v63 = vmul.f32 %v360_v59, %v360_v59  ;;  %v364_v4 = vsel %vm142_vm1, %v360_v59, 0.0 }
 0x3a7   :  { %v365_v5 = vadd.f32 %v364_v4, %v363_v60  ;;  %v371_v6 = vsel %vm142_vm1, %v369_v57, 0.0 }
 0x3a8   :  { %v372_v7 = vsel %vm142_vm1, %v370_v63, 0.0 }
 0x3a9   :  { %366 = vadd.xlane.f32.xlu1 %v365_v5  ;;  %v373_v8 = vadd.f32 %v372_v7, %v371_v6 }
 0x3ab   :  { %374 = vadd.xlane.f32.xlu0 %v373_v8 }
 0x3ba   :  { %394 = vperm.xlu1 %1004, %v52_v9  }
 0x436   :  { %v367_v10 = vpop.xlane.xlu1 %366 }
 0x437   :  { %v368_v11 = vmul.f32 0.00390625, %v367_v10 }
 0x438   :  { %v375_v12 = vpop.xlane.xlu0 %374 }
 0x439   :  { %v376_v13 = vmul.f32 0.00390625, %v375_v12  ;;  %v377_v14 = vmul.f32 %v368_v11, %v368_v11  ;;  %v380_v15 = vsub.f32 %v358_v56, %v368_v11  ;;  %v381_v16 = vsub.f32 %v360_v59, %v368_v11 }
 0x43a   :  { %v1332_v28 = vpop.permute.xlu1 %394 }
 0x43b   :  { %v378_v17 = vsub.f32 %v376_v13, %v377_v14 }
 0x43d   :  { %v379_v18 = vmax.f32 %v378_v17, 0.0 }
 0x43f   :  { %v382_v19 = vadd.f32 1e-05, %v379_v18 }
 0x441   :  { %1008 = vrsqrt.f32 %v382_v19 }
 0x44b   :  { %v1009_v21 = vpop.eup %1008 }
 0x44c   :  { %v384_v22 = vmul.f32 %v1009_v21, %v1329_v20 }
 0x44e   :  { %387 = vperm.xlu0 %1005, %v384_v22  }
 0x4cd   :  { %v388_v23 = vpop.permute.xlu0 %387 }
 0x4ce   :  { %v390_v26 = vmul.f32 %v388_v23, %v380_v15  ;;  %v391_v27 = vmul.f32 %v388_v23, %v381_v16 }
 0x4d0   :  { %v397_v29 = vadd.f32 %v1332_v28, %v390_v26  ;;  %v398_v33 = vadd.f32 %v1332_v28, %v391_v27 }
 0x4d2   :  { %v400_v37 = vmax.f32 %v398_v33, 0.0  ;;  %v399_v38 = vmax.f32 %v397_v29, 0.0 }
 0x4d4   :  { %960 = vmatprep.subr.msk.mxu0 %vm142_vm1, %v400_v37 }
 0x4d5   :  { %961 = vmatpush1.msk.msra.mxu0 %vm142_vm1, %v399_v38 }
 0x4d6   :  { %962 = vmatmul.mubr.msk.f32.vlgmr.msra.gmra.mrb[0].mxu0 %vm401_vm11, %v1336_v35  ;;  %523 = vmatprep.subr.mxu0 %v1341_v39 }
 0x4d7   :  { %524 = vmatpush1.msra.mxu0 %v1347_v36  ;;  %587 = vmatprep.mubr.f32.mxu0 %v1096_v0 }
 0x4da   :  { %965 = vmatmul.mubr.msk.f32.vlgmr.msra.gmra.mrb[2].mxu0 %vm67_vm0, %v1170_v3 }
 0x4db   :  { %787 = vmatprep.mubr.f32.mxu0 %v1096_v0 }
 0x5a9   :  { %v1358_v40 = vpop.f32.mrb[0].mxu0 }
 0x5aa   :  { %v1360_v42 = vpop.f32.mrb[1].mxu0  ;;  %v486_v44 = vmul.f32 %v1358_v40, %v1358_v40 }
 0x5ab   :  { %v1366_v45 = vadd.f32 %v1360_v42, %v1358_v40  ;;  %v487_v46 = vmul.f32 %v1360_v42, %v1360_v42 }
 0x5ad   :  { %v589_v47 = vpop.f32.mrb[2].mxu0  ;;  %v1370_v48 = vadd.f32 %v487_v46, %v486_v44 }
 0x5ae   :  { %v600_v3 = vmul.f32 %v589_v47, %v589_v47  ;;  %v591_v49 = vpop.f32.mrb[3].mxu0  ;;  %v594_v0 = vsel %vm142_vm1, %v589_v47, 0.0 }
 0x5af   :  { %v601_v50 = vmul.f32 %v591_v49, %v591_v49  ;;  %v595_v52 = vsel %vm142_vm1, %v591_v49, 0.0 }
 0x5b0   :  { %v596_v53 = vadd.f32 %v595_v52, %v594_v0  ;;  %v602_v56 = vsel %vm142_vm1, %v600_v3, 0.0 }
 0x5b1   :  { %v603_v57 = vsel %vm142_vm1, %v601_v50, 0.0 }
 0x5b2   :  { %597 = vadd.xlane.f32.xlu1 %v596_v53  ;;  %v604_v59 = vadd.f32 %v603_v57, %v602_v56 }
 0x5b4   :  { %605 = vadd.xlane.f32.xlu0 %v604_v59 }
 0x63f   :  { %v598_v60 = vpop.xlane.xlu1 %597 }
 0x640   :  { %v599_v63 = vmul.f32 0.00390625, %v598_v60 }
 0x641   :  { %v606_v4 = vpop.xlane.xlu0 %605 }
 0x642   :  { %v607_v5 = vmul.f32 0.00390625, %v606_v4  ;;  %v608_v6 = vmul.f32 %v599_v63, %v599_v63  ;;  %v611_v7 = vsub.f32 %v589_v47, %v599_v63  ;;  %v612_v8 = vsub.f32 %v591_v49, %v599_v63 }
 0x644   :  { %v609_v9 = vsub.f32 %v607_v5, %v608_v6 }
 0x646   :  { %v610_v10 = vmax.f32 %v609_v9, 0.0 }
 0x648   :  { %v613_v11 = vadd.f32 1e-05, %v610_v10 }
 0x64a   :  { %1010 = vrsqrt.f32 %v613_v11 }
 0x654   :  { %v1011_v12 = vpop.eup %1010 }
 0x655   :  { %v615_v13 = vmul.f32 %v1011_v12, %v1184_v25 }
 0x657   :  { %618 = vperm.xlu1 %1004, %v615_v13  }
 0x6d6   :  { %v619_v14 = vpop.permute.xlu1 %618 }
 0x6d7   :  { %v621_v15 = vmul.f32 %v619_v14, %v611_v7  ;;  %v622_v16 = vmul.f32 %v619_v14, %v612_v8 }
 0x6d9   :  { %v623_v17 = vadd.f32 %v621_v15, %v1190_v32  ;;  %v624_v18 = vadd.f32 %v622_v16, %v1190_v32 }
 0x6db   :  { %v625_v19 = vmax.f32 %v623_v17, 0.0  ;;  %v626_v21 = vmax.f32 %v624_v18, 0.0 }
 0x6dd   :  { %635 = vrot.lane.b32.xlu0 %v626_v21, %s1095_s13  ;;  %633 = vrot.lane.b32.xlu1 %v625_v19, %s1095_s13 }
 0x6e1   :  { %641 = vrot.lane.b32.xlu0 %v626_v21, %s1099_s24  ;;  %645 = vrot.lane.b32.xlu1 %v625_v19, %s1098_s23 }
 0x6e5   :  { %653 = vrot.lane.b32.xlu0 %v626_v21, %s1100_s25  ;;  %647 = vrot.lane.b32.xlu1 %v626_v21, %s1098_s23 }
 0x6e9   :  { %665 = vrot.lane.b32.xlu0 %v626_v21, %s1102_s27  ;;  %627 = vrot.lane.b32.xlu1 %v625_v19, %s1101_s26 }
 0x6ed   :  { %659 = vrot.lane.b32.xlu0 %v626_v21, %s1103_s28  ;;  %629 = vrot.lane.b32.xlu1 %v626_v21, %s1101_s26 }
 0x6f1   :  { %671 = vrot.lane.b32.xlu0 %v626_v21, %s1104_s29  ;;  %639 = vrot.lane.b32.xlu1 %v625_v19, %s1099_s24 }
 0x6f5   :  { %651 = vrot.lane.b32.xlu1 %v625_v19, %s1100_s25 }
 0x6f9   :  { %663 = vrot.lane.b32.xlu1 %v625_v19, %s1102_s27 }
 0x6fd   :  { %657 = vrot.lane.b32.xlu1 %v625_v19, %s1103_s28 }
 0x701   :  { %669 = vrot.lane.b32.xlu1 %v625_v19, %s1104_s29 }
 0x74f   :  { %v634_v25 = vpop.permute.xlu1 %633  ;;  %v636_v22 = vpop.permute.xlu0 %635 }
 0x750   :  { %v637_v29 = vsel %vm195_vm2, %v634_v25, %v636_v22  ;;  %v638_v33 = vsel %vm195_vm2, %v636_v22, %v634_v25 }
 0x751   :  { %v677_v3 = vrot.slane %v638_v33, 4  ;;  %v678_v49 = vrot.slane %v637_v29, 4 }
 0x753   :  { %v646_v32 = vpop.permute.xlu1 %645  ;;  %v642_v26 = vpop.permute.xlu0 %641 }
 0x757   :  { %v648_v23 = vpop.permute.xlu1 %647  ;;  %v654_v0 = vpop.permute.xlu0 %653 }
 0x758   :  { %v649_v38 = vsel %vm209_vm3, %v646_v32, %v648_v23  ;;  %v650_v44 = vsel %vm209_vm3, %v648_v23, %v646_v32 }
 0x759   :  { %v683_v50 = vrot.slane %v650_v44, 4  ;;  %v684_v52 = vrot.slane %v649_v38, 4 }
 0x75b   :  { %v628_v27 = vpop.permute.xlu1 %627  ;;  %v666_v9 = vpop.permute.xlu0 %665 }
 0x75f   :  { %v630_v37 = vpop.permute.xlu1 %629 }
 0x760   :  { %v631_v46 = vsel %vm188_vm4, %v628_v27, %v630_v37  ;;  %v632_v47 = vsel %vm188_vm4, %v630_v37, %v628_v27 }
 0x761   :  { %v699_v53 = vsel %vm142_vm1, %v632_v47, %v677_v3  ;;  %v700_v56 = vsel %vm142_vm1, %v631_v46, %v678_v49 }
 0x762   :  { %v707_v5 = vmul.f32 %v699_v53, %v1248_v55  ;;  %v708_v6 = vmul.f32 %v700_v56, %v1250_v58 }
 0x763   :  { %v640_v57 = vpop.permute.xlu1 %639 }
 0x764   :  { %v643_v59 = vsel %vm202_vm5, %v640_v57, %v642_v26  ;;  %v644_v60 = vsel %vm202_vm5, %v642_v26, %v640_v57 }
 0x765   :  { %v701_v63 = vsel %vm142_vm1, %v644_v60, %v683_v50  ;;  %v702_v4 = vsel %vm142_vm1, %v643_v59, %v684_v52 }
 0x766   :  { %v709_v7 = vmul.f32 %v701_v63, %v1254_v61  ;;  %v710_v8 = vmul.f32 %v702_v4, %v1256_v62  ;;  %v660_v62 = vpop.permute.xlu0 %659 }
 0x767   :  { %v652_v10 = vpop.permute.xlu1 %651 }
 0x768   :  { %v982_v11 = vpack.c.bf16 %v709_v7, %v707_v5  ;;  %v655_v12 = vsel %vm216_vm6, %v652_v10, %v654_v0  ;;  %v656_v13 = vsel %vm216_vm6, %v654_v0, %v652_v10  ;;  %v980_v14 = vpack.c.bf16 %v710_v8, %v708_v6 }
 0x769   :  { %v689_v15 = vrot.slane %v655_v12, 4  ;;  %v690_v16 = vrot.slane %v656_v13, 4 }
 0x76a   :  { %981 = vmatprep.subr.bf16.mxu0 %v980_v14  ;;  %v672_v38 = vpop.permute.xlu0 %671 }
 0x76b   :  { %983 = vmatpush1.bf16.msra.mxu0 %v982_v11  ;;  %v664_v55 = vpop.permute.xlu1 %663  ;;  %v703_v17 = vsel %vm142_vm1, %v625_v19, %v689_v15  ;;  %v704_v18 = vsel %vm142_vm1, %v626_v21, %v690_v16 }
 0x76c   :  { %v667_v58 = vsel %vm230_vm7, %v664_v55, %v666_v9  ;;  %v668_v61 = vsel %vm230_vm7, %v666_v9, %v664_v55  ;;  %v711_v33 = vmul.f32 %v703_v17, %v1279_v24  ;;  %v712_v21 = vmul.f32 %v704_v18, %v1289_v34 }
 0x76d   :  { %v695_v25 = vrot.slane %v667_v58, 4  ;;  %v696_v32 = vrot.slane %v668_v61, 4 }
 0x76f   :  { %v658_v22 = vpop.permute.xlu1 %657 }
 0x770   :  { %v661_v23 = vsel %vm223_vm8, %v658_v22, %v660_v62  ;;  %v662_v26 = vsel %vm223_vm8, %v660_v62, %v658_v22 }
 0x771   :  { %v705_v27 = vsel %vm142_vm1, %v661_v23, %v695_v25  ;;  %v706_v29 = vsel %vm142_vm1, %v662_v26, %v696_v32 }
 0x772   :  { %v713_v37 = vmul.f32 %v705_v27, %v1285_v30  ;;  %v714_v19 = vmul.f32 %v706_v29, %v1287_v31 }
 0x773   :  { %v670_v44 = vpop.permute.xlu1 %669 }
 0x774   :  { %v986_v46 = vpack.c.bf16 %v713_v37, %v711_v33  ;;  %v674_v47 = vsel %vm237_vm9, %v672_v38, %v670_v44  ;;  %v984_v3 = vpack.c.bf16 %v714_v19, %v712_v21  ;;  %v673_v0 = vsel %vm237_vm9, %v670_v44, %v672_v38 }
 0x775   :  { %v716_v49 = vmul.f32 %v674_v47, %v1301_v43  ;;  %v715_v24 = vmul.f32 %v673_v0, %v1307_v51 }
 0x776   :  { %985 = vmatprep.subr.bf16.mxu0 %v984_v3 }
 0x777   :  { %987 = vmatpush1.bf16.msra.mxu0 %v986_v46 }
 0x778   :  { %966 = vmatprep.subr.msk.mxu0 %vm142_vm1, %v716_v49 }
 0x77b   :  { %967 = vmatpush1.msk.msra.mxu0 %vm142_vm1, %v715_v24 }
 0x77c   :  { %968 = vmatmul.mubr.msk.f32.vlgmr.msra.gmra.mrb[4].mxu0 %vm282_vm10, %v1313_v54 }
 0x84f   :  { %v789_v30 = vpop.f32.mrb[4].mxu0 }
 0x850   :  { %v800_v31 = vmul.f32 %v789_v30, %v789_v30  ;;  %v791_v34 = vpop.f32.mrb[5].mxu0  ;;  %v794_v50 = vsel %vm142_vm1, %v789_v30, 0.0 }
 0x851   :  { %v795_v43 = vsel %vm142_vm1, %v791_v34, 0.0  ;;  %v801_v41 = vmul.f32 %v791_v34, %v791_v34 }
 0x852   :  { %v796_v52 = vadd.f32 %v795_v43, %v794_v50  ;;  %v802_v53 = vsel %vm142_vm1, %v800_v31, 0.0 }
 0x853   :  { %v803_v56 = vsel %vm142_vm1, %v801_v41, 0.0 }
 0x854   :  { %797 = vadd.xlane.f32.xlu1 %v796_v52  ;;  %v804_v51 = vadd.f32 %v803_v56, %v802_v53 }
 0x856   :  { %805 = vadd.xlane.f32.xlu0 %v804_v51 }
 0x858   :  { %483 = vadd.xlane.f32.xlu1 %v1366_v45 }
 0x85c   :  { %489 = vadd.xlane.f32.xlu1 %v1370_v48 }
 0x8e1   :  { %v798_v54 = vpop.xlane.xlu1 %797 }
 0x8e2   :  { %v799_v57 = vmul.f32 0.00390625, %v798_v54 }
 0x8e3   :  { %v806_v59 = vpop.xlane.xlu0 %805 }
 0x8e4   :  { %v807_v60 = vmul.f32 0.00390625, %v806_v59  ;;  %v808_v63 = vmul.f32 %v799_v57, %v799_v57  ;;  %v811_v4 = vsub.f32 %v789_v30, %v799_v57  ;;  %v812_v5 = vsub.f32 %v791_v34, %v799_v57  ;;  %v54_v30 = vld [vmem:[%s1491_s2 + $0x28] sm:$0xff] }
 0x8e5   :  { %v484_v6 = vpop.xlane.xlu1 %483 }
 0x8e6   :  { %v809_v7 = vsub.f32 %v807_v60, %v808_v63  ;;  %v485_v8 = vmul.f32 0.00390625, %v484_v6 }
 0x8e8   :  { %v810_v9 = vmax.f32 %v809_v7, 0.0  ;;  %v495_v10 = vsub.f32 %v1358_v40, %v485_v8  ;;  %v496_v11 = vsub.f32 %v1360_v42, %v485_v8 }
 0x8e9   :  { %v490_v40 = vpop.xlane.xlu1 %489 }
 0x8ea   :  { %v813_v12 = vadd.f32 1e-05, %v810_v9  ;;  %v491_v42 = vmul.f32 0.00390625, %v490_v40 }
 0x8ec   :  { %1012 = vrsqrt.f32 %v813_v12 }
 0x8f6   :  { %v1013_v45 = vpop.eup %1012 }
 0x8f7   :  { %v815_v48 = vmul.f32 %v1013_v45, %v1329_v20  ;;  %v492_v20 = vmul.f32 %v485_v8, %v485_v8 }
 0x8f9   :  { %818 = vperm.xlu0 %1005, %v815_v48   ;;  %v493_v62 = vsub.f32 %v491_v42, %v492_v20 }
 0x8fb   :  { %v494_v32 = vmax.f32 %v493_v62, 0.0 }
 0x8fd   :  { %v497_v26 = vadd.f32 1e-05, %v494_v32 }
 0x8ff   :  { %1014 = vrsqrt.f32 %v497_v26 }
 0x909   :  { %v1015_v27 = vpop.eup %1014 }
 0x978   :  { %v819_v13 = vpop.permute.xlu0 %818 }
 0x979   :  { %v821_v14 = vmul.f32 %v819_v13, %v811_v4  ;;  %v822_v15 = vmul.f32 %v819_v13, %v812_v5 }
 0x97b   :  { %v823_v16 = vadd.f32 %v821_v14, %v1332_v28  ;;  %v824_v55 = vadd.f32 %v822_v15, %v1332_v28 }
 0x97d   :  { %v825_v58 = vmax.f32 %v823_v16, 0.0  ;;  %v826_v61 = vmax.f32 %v824_v55, 0.0 }
 0x97f   :  { %969 = vmatprep.subr.msk.mxu1 %vm142_vm1, %v826_v61 }
 0x980   :  { %970 = vmatpush1.msk.msra.mxu1 %vm142_vm1, %v825_v58 }
 0x981   :  { %971 = vmatmul.mubr.msk.f32.vlgmr.msra.gmra.mrb[4].mxu1 %vm401_vm11, %v1336_v35  ;;  %v53_v35 = vld [vmem:[%s1491_s2 + $0x20] sm:$0xff]  ;;  %s1062_s2 = scalar_lea.vmem %s944_s17, 512 }
 0x982   :  { %v499_v29 = vmul.f32 %v1015_v27, %v53_v35  ;;  %p1063_p2 = scmp.ne.s32.totalorder %s944_s17, %s1062_s2  ;;  %p1068_p4 = scmp.lt.s32.totalorder %s1062_s2, %s1062_s2 }
 0x984   :  { %p1069_p5 = por %p1068_p4, %p1067_p3 }
 0x986   :  { %p1070_p6 = pnand %p1069_p5, %p1063_p2 }
 0xa54   :  { %v899_v17 = vpop.f32.mrb[4].mxu1 }
 0xa55   :  { %v901_v18 = vpop.f32.mrb[5].mxu1  ;;  %v908_v25 = vmul.f32 %v899_v17, %v899_v17 }
 0xa56   :  { %v909_v22 = vmul.f32 %v901_v18, %v901_v18  ;;  %v904_v23 = vadd.f32 %v901_v18, %v899_v17 }
 0xa58   :  { %905 = vadd.xlane.f32.xlu1 %v904_v23  ;;  %v910_v28 = vadd.f32 %v909_v22, %v908_v25 }
 0xa5c   :  { %911 = vadd.xlane.f32.xlu1 %v910_v28 }
 0xa6d   :  { %502 = vperm.xlu1 %1004, %v499_v29  }
 0xae5   :  { %v906_v33 = vpop.xlane.xlu1 %905 }
 0xae6   :  { %v907_v37 = vmul.f32 0.00390625, %v906_v33 }
 0xae8   :  { %v917_v19 = vsub.f32 %v899_v17, %v907_v37  ;;  %v918_v21 = vsub.f32 %v901_v18, %v907_v37  ;;  %v914_v44 = vmul.f32 %v907_v37, %v907_v37 }
 0xae9   :  { %v912_v38 = vpop.xlane.xlu1 %911 }
 0xaea   :  { %v913_v46 = vmul.f32 0.00390625, %v912_v38 }
 0xaec   :  { %v915_v47 = vsub.f32 %v913_v46, %v914_v44 }
 0xaed   :  { %v503_v31 = vpop.permute.xlu1 %502 }
 0xaee   :  { %v916_v3 = vmax.f32 %v915_v47, 0.0  ;;  %v505_v50 = vmul.f32 %v503_v31, %v495_v10  ;;  %v506_v43 = vmul.f32 %v503_v31, %v496_v11 }
 0xaf0   :  { %v919_v49 = vadd.f32 1e-05, %v916_v3 }
 0xaf2   :  { %1016 = vrsqrt.f32 %v919_v49 }
 0xafc   :  { %v1017_v0 = vpop.eup %1016 }
 0xafd   :  { %v921_v24 = vmul.f32 %v1017_v0, %v53_v35 }
 0xaff   :  { %924 = vperm.xlu0 %1005, %v921_v24  }
 0xb03   :  { %509 = vperm.xlu0 %1005, %v54_v30  }
 0xb7e   :  { %v925_v34 = vpop.permute.xlu0 %924 }
 0xb7f   :  { %v927_v41 = vmul.f32 %v925_v34, %v917_v19  ;;  %v928_v52 = vmul.f32 %v925_v34, %v918_v21 }
 0xb82   :  { %v510_v53 = vpop.permute.xlu0 %509 }
 0xb83   :  { %v512_v56 = vadd.f32 %v510_v53, %v505_v50  ;;  %v513_v51 = vadd.f32 %v510_v53, %v506_v43  ;;  %v929_v54 = vadd.f32 %v927_v41, %v510_v53  ;;  %v930_v57 = vadd.f32 %v928_v52, %v510_v53 }
 0xb85   :  { %v514_v59 = vadd.f32 %v512_v56, %v1168_v2  ;;  %v515_v60 = vadd.f32 %v513_v51, %v1163_v1  ;;  %v931_v63 = vadd.f32 %v1347_v36, %v929_v54  ;;  %v932_v4 = vadd.f32 %v1341_v39, %v930_v57 }
 0xb87   :  { %v516_v5 = vmax.f32 %v514_v59, 0.0  ;;  %v517_v6 = vmax.f32 %v515_v60, 0.0  ;;  %v933_v7 = vmax.f32 %v931_v63, 0.0  ;;  %v934_v8 = vmax.f32 %v932_v4, 0.0 }
 0xb89   :  { %518 = vst [vmem:[#allocation7] sm:$0xff] %v516_v5  ;;  %519 = vst [vmem:[#allocation7 + $0x8] sm:$0xff] %v517_v6 }
 0xb8a   :  { %936 = vst [vmem:[#allocation7 + $0x10] sm:$0xff] %v933_v7  ;;  %937 = vst [vmem:[#allocation7 + $0x18] sm:$0xff] %v934_v8 }
 0xb8b   :  { %1073 = shalt.err (!%p1070_p6)
}
 0xb8c   :  { %s1074_s3 = scalar_lea.hbm %s1493_s4, 512 }
 0xb8d   :  { %p1075_p7 = scmp.ne.s32.totalorder %s1493_s4, %s1074_s3  ;;  %p1078_p8 = scmp.lt.u32.totalorder %s1074_s3, %s1493_s4 }
 0xb8f   :  { %p1080_p9 = pnand %p1078_p8, %p1075_p7 }
 0xb91   :  { %1083 = shalt.err (!%p1080_p9)
}
 0xb92   :  { %949 = dma.vmem_to_hbm [thread:$0]  %s944_s17, 512, %s1493_s4, [#allocation4], %s1094_s1, %s1094_s1, %s1095_s13  }
 0xb93   :  { %1088 = dma.done.wait [#allocation4], 512  }
 0xb94   :  { %1089 = vsyncadd [#allocation4], 4294966784 }
 0xb95   :  { %953 = vsyncpa [#allocation3], 1 }
 0xb96   :  { %954 = vsyncpa [#allocation6], 1 }
 0xb97   :  { %955 = vsyncpa [#allocation4], 1 }

</bundles_post_ra>
